<compile_context>
chip_gen: v7x
topology: tpu7x:2x2x1
jax: 0.10.0
libtpu: 0.0.40
codegen_flags: <defaults>
</compile_context>

<pallas_src>
import jax
import jax.numpy as jnp
from jax.experimental import pallas as pl
from jax.experimental.pallas import tpu as pltpu


def _round_up(n: int, m: int) -> int:
    return ((n + m - 1) // m) * m


def policy_net_kernel(x_ref, w1_ref, b1_ref, w2_ref, b2_ref, out_ref):
    """One batch tile (feature-major): out^T = tanh(W2 @ relu(W1 @ x^T + b1) + b2)."""
    x = x_ref[...]        # (S, TB)   batch on lanes
    w1 = w1_ref[...]      # (Hd, S)
    s = x.shape[0]        # static

    if s <= 8:
        # K (= state_dim) is tiny: a (Hd,S)@(S,TB) matmul would be almost all
        # MXU padding, so do fc1 on the VPU as S unrolled broadcast-MACs.
        acc = w1[:, 0:1] * x[0:1, :]
        for k in range(1, s):
            acc = acc + w1[:, k:k + 1] * x[k:k + 1, :]
    else:
        acc = jnp.dot(w1, x, preferred_element_type=jnp.float32)
    h = jnp.maximum(acc + b1_ref[...], 0.0)                          # (Hd, TB)

    # fc2 on the MXU: (A8, Hd) @ (Hd, TB), f32 accumulation; tanh on the EUP.
    a = jnp.dot(w2_ref[...], h, preferred_element_type=jnp.float32)  # (A8, TB)
    out_ref[...] = jnp.tanh(a + b2_ref[...])                         # lane-dense store


def prepare_policy_params(w1, b1, w2, b2):
    """Pad / relayout PyTorch-layout params ONCE (hoisted out of the hot path).

    Inputs use torch.nn.Linear layout: w1 (hidden, state), b1 (hidden,),
    w2 (action, hidden), b2 (action,).  Outputs are feature-major with the
    hidden / action dims zero-padded to sublane multiples of 8; padded rows
    stay exact zeros through relu/tanh and are sliced off in the forward.
    """
    hidden_dim, state_dim = w1.shape
    action_dim = w2.shape[0]
    hd = _round_up(hidden_dim, 8)
    ad = _round_up(action_dim, 8)
    f32 = jnp.float32
    w1p = jnp.zeros((hd, state_dim), f32).at[:hidden_dim, :].set(w1.astype(f32))
    b1p = jnp.zeros((hd, 1), f32).at[:hidden_dim, 0].set(jnp.reshape(b1.astype(f32), (-1,)))
    w2p = jnp.zeros((ad, hd), f32).at[:action_dim, :hidden_dim].set(w2.astype(f32))
    b2p = jnp.zeros((ad, 1), f32).at[:action_dim, 0].set(jnp.reshape(b2.astype(f32), (-1,)))
    return w1p, b1p, w2p, b2p


def _choose_batch_tiling(batch, block_batch):
    """Pick (tb, n_tiles, b_pad): lane tile is a multiple of 128, tiles are
    balanced (last tile never mostly padding), and an even tile count is
    preferred when it adds no extra padding (balanced 2-TC split on v7x)."""
    b128 = _round_up(batch, 128)
    tb_cap = min(max(128, _round_up(block_batch, 128)), b128)
    n_tiles = pl.cdiv(b128, tb_cap)
    tb = _round_up(pl.cdiv(b128, n_tiles), 128)
    if n_tiles > 1 and n_tiles % 2 == 1:
        tb_even = _round_up(pl.cdiv(b128, n_tiles + 1), 128)
        if tb_even * (n_tiles + 1) <= tb * n_tiles:   # only if padding does not grow
            n_tiles += 1
            tb = tb_even
    return tb, n_tiles, tb * n_tiles


def policy_net_forward(x, w1p, b1p, w2p, b2p, action_dim, *,
                       block_batch=4096, v7x_core_parallel=False):
    """DDPG actor forward: tanh(relu(fc1(x)) -> fc2) via a Pallas kernel.

    Takes PREPARED params from prepare_policy_params (padding hoisted out of
    the per-call path).  x is (batch, state_dim); returns (batch, action_dim).
    """
    batch, state_dim = x.shape
    hd = w1p.shape[0]
    ad = w2p.shape[0]
    assert w1p.shape == (hd, state_dim) and b1p.shape == (hd, 1)
    assert w2p.shape == (ad, hd) and b2p.shape == (ad, 1)

    tb, n_tiles, b_pad = _choose_batch_tiling(batch, block_batch)

    # Feature-major activations: batch on the lane axis; pad only the remainder.
    x_t = x.astype(jnp.float32).T                       # (S, B)
    if b_pad != batch:
        x_t = jnp.pad(x_t, ((0, 0), (0, b_pad - batch)))

    # De-padded cost estimate (output is (ad, b_pad), not a 128-wide pad).
    cost = pl.CostEstimate(
        flops=2 * b_pad * (state_dim * hd + hd * ad),
        transcendentals=b_pad * ad,
        bytes_accessed=4 * (state_dim * b_pad + ad * b_pad
                            + hd * state_dim + hd + ad * hd + ad),
    )

    # On v7x, set v7x_core_parallel=True to shard the batch axis across both
    # TensorCores; PARALLEL is kept as the portable default (no-op on 1-TC chips).
    batch_sem = pltpu.CORE_PARALLEL if v7x_core_parallel else pltpu.PARALLEL

    out_t = pl.pallas_call(
        policy_net_kernel,
        out_shape=jax.ShapeDtypeStruct((ad, b_pad), jnp.float32),
        grid_spec=pltpu.PrefetchScalarGridSpec(
            num_scalar_prefetch=0,
            grid=(n_tiles,),
            in_specs=[
                pl.BlockSpec((state_dim, tb), lambda i: (0, i)),  # x^T: streamed
                pl.BlockSpec((hd, state_dim), lambda i: (0, 0)),  # W1: resident
                pl.BlockSpec((hd, 1), lambda i: (0, 0)),          # b1
                pl.BlockSpec((ad, hd), lambda i: (0, 0)),         # W2
                pl.BlockSpec((ad, 1), lambda i: (0, 0)),          # b2
            ],
            out_specs=pl.BlockSpec((ad, tb), lambda i: (0, i)),   # out^T: lane-dense
        ),
        compiler_params=pltpu.CompilerParams(
            dimension_semantics=(batch_sem,),
        ),
        cost_estimate=cost,
    )(x_t, w1p, b1p, w2p, b2p)

    return out_t[:action_dim, :batch].T


def init_policy_params(key, state_dim, hidden_dim, action_dim):
    """torch.nn.Linear-style init: U(-1/sqrt(fan_in), 1/sqrt(fan_in)), PyTorch layout."""
    k1, k2, k3, k4 = jax.random.split(key, 4)
    lim1 = 1.0 / jnp.sqrt(jnp.float32(state_dim))
    lim2 = 1.0 / jnp.sqrt(jnp.float32(hidden_dim))
    w1 = jax.random.uniform(k1, (hidden_dim, state_dim), jnp.float32, -lim1, lim1)
    b1 = jax.random.uniform(k2, (hidden_dim,), jnp.float32, -lim1, lim1)
    w2 = jax.random.uniform(k3, (action_dim, hidden_dim), jnp.float32, -lim2, lim2)
    b2 = jax.random.uniform(k4, (action_dim,), jnp.float32, -lim2, lim2)
    return w1, b1, w2, b2


if __name__ == "__main__":
    # Small shapes consistent with the module: state -> hidden -> action.
    batch, state_dim, hidden_dim, action_dim = 2, 4, 32, 2
    action_bound = 2.0  # kept for parity with __init__; unused in forward (matches PyTorch)

    key = jax.random.PRNGKey(0)
    kx, kp = jax.random.split(key)
    x = jax.random.normal(kx, (batch, state_dim), jnp.float32)
    w1, b1, w2, b2 = init_policy_params(kp, state_dim, hidden_dim, action_dim)

    # Hoisted: pad/relayout weights once per weight update, not per forward call.
    w1p, b1p, w2p, b2p = prepare_policy_params(w1, b1, w2, b2)

    def ref_forward(xv):
        return jnp.tanh(jnp.maximum(xv @ w1.T + b1, 0.0) @ w2.T + b2)

    out = jax.block_until_ready(
        policy_net_forward(x, w1p, b1p, w2p, b2p, action_dim))
    assert out.shape == (batch, action_dim)
    assert jnp.allclose(out, ref_forward(x), atol=1e-5, rtol=1e-5)

    # Larger batch exercising the multi-tile grid path (small block_batch forces >1 tile).
    big_b = 600
    xb = jax.random.normal(kx, (big_b, state_dim), jnp.float32)
    outb = jax.block_until_ready(
        policy_net_forward(xb, w1p, b1p, w2p, b2p, action_dim, block_batch=256))
    assert outb.shape == (big_b, action_dim)
    assert jnp.allclose(outb, ref_forward(xb), atol=1e-5, rtol=1e-5)

    print("KERNEL_OK")
</pallas_src>

<mosaic_0001>
module attributes {stable_mosaic.version = 11 : i64} {
  func.func @policy_net_kernel(%arg0: i32, %arg1: memref<4x128xf32, #tpu.memory_space<vmem>>, %arg2: memref<32x4xf32, #tpu.memory_space<vmem>>, %arg3: memref<32x1xf32, #tpu.memory_space<vmem>>, %arg4: memref<8x32xf32, #tpu.memory_space<vmem>>, %arg5: memref<8x1xf32, #tpu.memory_space<vmem>>, %arg6: memref<8x128xf32, #tpu.memory_space<vmem>>) attributes {dimension_semantics = [#tpu.dimension_semantics<parallel>], iteration_bounds = array<i64: 1>, scalar_prefetch = 0 : i64, scratch_operands = 0 : i64, tpu.core_type = #tpu.core_type<tc>, window_params = [{transform_indices = @transform_0, window_bounds = array<i64: 4, 128>}, {pipeline_mode = #tpu.pipeline_mode<synchronous>, transform_indices = @transform_1, window_bounds = array<i64: 32, 4>}, {pipeline_mode = #tpu.pipeline_mode<synchronous>, transform_indices = @transform_2, window_bounds = array<i64: 32, 1>}, {pipeline_mode = #tpu.pipeline_mode<synchronous>, transform_indices = @transform_3, window_bounds = array<i64: 8, 32>}, {pipeline_mode = #tpu.pipeline_mode<synchronous>, transform_indices = @transform_4, window_bounds = array<i64: 8, 1>}, {transform_indices = @transform_5, window_bounds = array<i64: 8, 128>}]} {
    %c0 = arith.constant 0 : index
    %c0_0 = arith.constant 0 : index
    %0 = vector.load %arg1[%c0, %c0_0] : memref<4x128xf32, #tpu.memory_space<vmem>>, vector<4x128xf32>
    %c0_1 = arith.constant 0 : index
    %c0_2 = arith.constant 0 : index
    %1 = vector.load %arg2[%c0_1, %c0_2] : memref<32x4xf32, #tpu.memory_space<vmem>>, vector<32x4xf32>
    %2 = vector.extract_strided_slice %1 {offsets = [0, 0], sizes = [32, 1], strides = [1, 1]} : vector<32x4xf32> to vector<32x1xf32>
    %3 = vector.extract_strided_slice %0 {offsets = [0, 0], sizes = [1, 128], strides = [1, 1]} : vector<4x128xf32> to vector<1x128xf32>
    %4 = vector.broadcast %2 : vector<32x1xf32> to vector<32x128xf32>
    %5 = vector.broadcast %3 : vector<1x128xf32> to vector<32x128xf32>
    %6 = arith.mulf %4, %5 : vector<32x128xf32>
    %7 = vector.extract_strided_slice %1 {offsets = [0, 1], sizes = [32, 1], strides = [1, 1]} : vector<32x4xf32> to vector<32x1xf32>
    %8 = vector.extract_strided_slice %0 {offsets = [1, 0], sizes = [1, 128], strides = [1, 1]} : vector<4x128xf32> to vector<1x128xf32>
    %9 = vector.broadcast %7 : vector<32x1xf32> to vector<32x128xf32>
    %10 = vector.broadcast %8 : vector<1x128xf32> to vector<32x128xf32>
    %11 = arith.mulf %9, %10 : vector<32x128xf32>
    %12 = arith.addf %6, %11 : vector<32x128xf32>
    %13 = vector.extract_strided_slice %1 {offsets = [0, 2], sizes = [32, 1], strides = [1, 1]} : vector<32x4xf32> to vector<32x1xf32>
    %14 = vector.extract_strided_slice %0 {offsets = [2, 0], sizes = [1, 128], strides = [1, 1]} : vector<4x128xf32> to vector<1x128xf32>
    %15 = vector.broadcast %13 : vector<32x1xf32> to vector<32x128xf32>
    %16 = vector.broadcast %14 : vector<1x128xf32> to vector<32x128xf32>
    %17 = arith.mulf %15, %16 : vector<32x128xf32>
    %18 = arith.addf %12, %17 : vector<32x128xf32>
    %19 = vector.extract_strided_slice %1 {offsets = [0, 3], sizes = [32, 1], strides = [1, 1]} : vector<32x4xf32> to vector<32x1xf32>
    %20 = vector.extract_strided_slice %0 {offsets = [3, 0], sizes = [1, 128], strides = [1, 1]} : vector<4x128xf32> to vector<1x128xf32>
    %21 = vector.broadcast %19 : vector<32x1xf32> to vector<32x128xf32>
    %22 = vector.broadcast %20 : vector<1x128xf32> to vector<32x128xf32>
    %23 = arith.mulf %21, %22 : vector<32x128xf32>
    %24 = arith.addf %18, %23 : vector<32x128xf32>
    %c0_3 = arith.constant 0 : index
    %c0_4 = arith.constant 0 : index
    %25 = vector.load %arg3[%c0_3, %c0_4] : memref<32x1xf32, #tpu.memory_space<vmem>>, vector<32x1xf32>
    %26 = vector.broadcast %25 : vector<32x1xf32> to vector<32x128xf32>
    %27 = arith.addf %24, %26 : vector<32x128xf32>
    %cst = arith.constant 0.000000e+00 : f32
    %28 = vector.broadcast %cst : f32 to vector<32x128xf32>
    %29 = arith.maximumf %27, %28 : vector<32x128xf32>
    %c0_5 = arith.constant 0 : index
    %c0_6 = arith.constant 0 : index
    %30 = vector.load %arg4[%c0_5, %c0_6] : memref<8x32xf32, #tpu.memory_space<vmem>>, vector<8x32xf32>
    %cst_7 = arith.constant dense<0.000000e+00> : vector<8x128xf32>
    %31 = tpu.matmul %30, %29, %cst_7 {dimension_numbers = #tpu.dot_dimension_numbers<[1], [0], [0], [1], [0, 0, 1, 1], [], []>} : vector<8x32xf32>, vector<32x128xf32>, vector<8x128xf32> -> vector<8x128xf32>
    %c0_8 = arith.constant 0 : index
    %c0_9 = arith.constant 0 : index
    %32 = vector.load %arg5[%c0_8, %c0_9] : memref<8x1xf32, #tpu.memory_space<vmem>>, vector<8x1xf32>
    %33 = vector.broadcast %32 : vector<8x1xf32> to vector<8x128xf32>
    %34 = arith.addf %31, %33 : vector<8x128xf32>
    %35 = math.tanh %34 : vector<8x128xf32>
    %c0_10 = arith.constant 0 : index
    %c0_11 = arith.constant 0 : index
    %36 = vector.load %arg6[%c0_10, %c0_11] : memref<8x128xf32, #tpu.memory_space<vmem>>, vector<8x128xf32>
    tpu.vector_store %arg6[%c0_10, %c0_11], %35 {strides = array<i32>} : memref<8x128xf32, #tpu.memory_space<vmem>>, vector<8x128xf32>,
    return
  }
  func.func @transform_0(%arg0: i32) -> (i32, i32) {
    %c0_i32 = arith.constant 0 : i32
    %c0_i32_0 = arith.constant 0 : i32
    return %c0_i32, %arg0 : i32, i32
  }
  func.func @transform_1(%arg0: i32) -> (i32, i32) {
    %c0_i32 = arith.constant 0 : i32
    %c0_i32_0 = arith.constant 0 : i32
    %c0_i32_1 = arith.constant 0 : i32
    return %c0_i32, %c0_i32_0 : i32, i32
  }
  func.func @transform_2(%arg0: i32) -> (i32, i32) {
    %c0_i32 = arith.constant 0 : i32
    %c0_i32_0 = arith.constant 0 : i32
    %c0_i32_1 = arith.constant 0 : i32
    return %c0_i32, %c0_i32_0 : i32, i32
  }
  func.func @transform_3(%arg0: i32) -> (i32, i32) {
    %c0_i32 = arith.constant 0 : i32
    %c0_i32_0 = arith.constant 0 : i32
    %c0_i32_1 = arith.constant 0 : i32
    return %c0_i32, %c0_i32_0 : i32, i32
  }
  func.func @transform_4(%arg0: i32) -> (i32, i32) {
    %c0_i32 = arith.constant 0 : i32
    %c0_i32_0 = arith.constant 0 : i32
    %c0_i32_1 = arith.constant 0 : i32
    return %c0_i32, %c0_i32_0 : i32, i32
  }
  func.func @transform_5(%arg0: i32) -> (i32, i32) {
    %c0_i32 = arith.constant 0 : i32
    %c0_i32_0 = arith.constant 0 : i32
    return %c0_i32, %arg0 : i32, i32
  }
}

</mosaic_0001>

<bundles_post_ra>
// kernel: tpu_custom_call.1
= control target key start
LH: loop header
LB: loop body
LE: loop exit
PB: predicated region body
PF: predicated region fallthrough
CT: control target
= control target key end

     0   :  { %v335_v1 = vmov 3   ;;  %v336_v2 = vmov 1   ;;  %s420_s0 = inlined_call_operand.vmem [shape: f32[4,128], index: 0, kind: input, shape index: {}]   ;;  %s421_s1 = inlined_call_operand.vmem [shape: f32[32,4], index: 1, kind: input, shape index: {}]   ;;  %s422_s2 = inlined_call_operand.vmem [shape: f32[32,1], index: 2, kind: input, shape index: {}]   ;;  %s423_s3 = inlined_call_operand.vmem [shape: f32[8,32], index: 3, kind: input, shape index: {}]   ;;  %s424_s4 = inlined_call_operand.vmem [shape: f32[8,1], index: 4, kind: input, shape index: {}]   ;;  %s425_s5 = inlined_call_operand.hbm [shape: f32[8,128], index: 5, kind: output, shape index: {}]  }
   0x1   :  { %v22_v0 = vld [vmem:[%s421_s1] sm:$0xff]  ;;  %302 = vset.pattern.permute.xlu0 %v335_v1  ;;  %298 = vset.pattern.permute.xlu1 %v336_v2  ;;  %v23_v3 = vld [vmem:[%s421_s1 + $0x8] sm:$0xff] }
   0x2   :  { %111 = vperm.xlu0 %302, %v22_v0   ;;  %55 = vperm.xlu1 %298, %v22_v0  }
   0x3   :  { %10 = vsyncpa [#allocation3], 0  ;;  %v337_v4 = vmov 2   ;;  %v25_v5 = vld [vmem:[%s421_s1 + $0x18] sm:$0xff]  ;;  %v24_v6 = vld [vmem:[%s421_s1 + $0x10] sm:$0xff]  ;;  %v338_v7 = vmov 0   ;;  %v46_v22 = vlaneseq }
   0x4   :  { %v138_v8 = vld [vmem:[%s422_s2] sm:$0xff]  ;;  %v141_v9 = vld [vmem:[%s422_s2 + $0x18] sm:$0xff]  ;;  %v139_v10 = vld [vmem:[%s422_s2 + $0x8] sm:$0xff]  ;;  %v339_v13 = vmov 0.0|0.0   ;;  %vm340_vm0 = vmmov 0   ;;  %v341_v14 = vmov 0.0  }
   0x5   :  { %v140_v11 = vld [vmem:[%s422_s2 + $0x10] sm:$0xff]  ;;  %v171_v12 = vld [vmem:[%s424_s4] sm:$0xff]  ;;  %284 = vmatprep.subr.bf16.mxu0 %v339_v13  ;;  %281 = vmatprep.mubr.msk.f32.mxu0 %vm340_vm0, %v341_v14  ;;  %v47_v25 = vshrl.u32 %v46_v22, 7  ;;  %vm177_vm1 = vcmask 261120   ;;  %s342_s11 = smov [#allocation2]  }
   0x6   :  { %303 = vset.pattern.permute.xlu0 %v337_v4  ;;  %59 = vperm.xlu1 %298, %v23_v3   ;;  %v21_v29 = vld [vmem:[%s420_s0] sm:$0xf]  ;;  %s259_s12 = sshll.u32 %s342_s11, 4  ;;  %s260_s12 = int_to_ptr.vmem [resolvable:$true] %s259_s12 }
   0x7   :  { %83 = vperm.xlu0 %303, %v22_v0   ;;  %v48_v27 = vsub.s32 0, %v47_v25  ;;  %v72_v28 = vsub.s32 1, %v47_v25  ;;  %v100_v33 = vsub.s32 2, %v47_v25  ;;  %v128_v35 = vsub.s32 3, %v47_v25  ;;  %s311_s13 = scalar_lea.vmem %s260_s12, 128  ;;  %p316_p1 = scmp.lt.s32.totalorder %s260_s12, %s260_s12 }
   0x8   :  { %p312_p0 = scmp.ne.s32.totalorder %s260_s12, %s311_s13  ;;  %p317_p2 = scmp.lt.s32.totalorder %s311_s13, %s311_s13 }
   0x9   :  { %v49_v31 = vrot.slane %v21_v29, %v48_v27  ;;  %v73_v34 = vrot.slane %v21_v29, %v72_v28  ;;  %v101_v37 = vrot.slane %v21_v29, %v100_v33  ;;  %v129_v41 = vrot.slane %v21_v29, %v128_v35 }
   0xa   :  { %299 = vset.pattern.permute.xlu1 %v337_v4  ;;  %p318_p3 = por %p317_p2, %p316_p1 }
   0xb   :  { %95 = vperm.xlu0 %303, %v25_v5   ;;  %87 = vperm.xlu1 %299, %v23_v3  }
   0xc   :  { %p319_p4 = pnand %p318_p3, %p312_p0 }
   0xf   :  { %306 = vset.pattern.permute.xlu0 %v338_v7  ;;  %300 = vset.pattern.permute.xlu1 %v338_v7 }
  0x10   :  { %28 = vperm.xlu0 %306, %v22_v0   ;;  %38 = vperm.xlu1 %300, %v24_v6  }
  0x14   :  { %33 = vperm.xlu0 %306, %v23_v3   ;;  %301 = vset.pattern.permute.xlu1 %v336_v2 }
  0x15   :  { %63 = vperm.xlu1 %301, %v24_v6  }
  0x18   :  { %43 = vperm.xlu0 %306, %v25_v5  }
  0x19   :  { %67 = vperm.xlu1 %301, %v25_v5  }
  0x1c   :  { %144 = vperm.xlu0 %306, %v138_v8  }
  0x1d   :  { %304 = vset.pattern.permute.xlu1 %v335_v1 }
  0x1e   :  { %115 = vperm.xlu1 %304, %v23_v3  }
  0x20   :  { %159 = vperm.xlu0 %306, %v141_v9  }
  0x22   :  { %305 = vset.pattern.permute.xlu1 %v337_v4 }
  0x23   :  { %91 = vperm.xlu1 %305, %v24_v6  }
  0x27   :  { %307 = vset.pattern.permute.xlu1 %v335_v1 }
  0x28   :  { %119 = vperm.xlu1 %307, %v24_v6  }
  0x2c   :  { %123 = vperm.xlu1 %307, %v25_v5  }
  0x30   :  { %308 = vset.pattern.permute.xlu1 %v338_v7 }
  0x31   :  { %149 = vperm.xlu1 %308, %v139_v10  }
  0x35   :  { %154 = vperm.xlu1 %308, %v140_v11  }
  0x39   :  { %174 = vperm.xlu1 %308, %v171_v12  }
  0x81   :  { %v56_v15 = vpop.permute.xlu1 %55  ;;  %v112_v16 = vpop.permute.xlu0 %111 }
  0x82   :  { %v74_v40 = vmul.f32 %v73_v34, %v56_v15  ;;  %v130_v49 = vmul.f32 %v129_v41, %v112_v16 }
  0x85   :  { %v60_v17 = vpop.permute.xlu1 %59 }
  0x86   :  { %v84_v18 = vpop.permute.xlu0 %83  ;;  %v75_v47 = vmul.f32 %v73_v34, %v60_v17 }
  0x87   :  { %v102_v42 = vmul.f32 %v101_v37, %v84_v18 }
  0x8a   :  { %v88_v19 = vpop.permute.xlu1 %87  ;;  %v96_v21 = vpop.permute.xlu0 %95 }
  0x8b   :  { %v105_v50 = vmul.f32 %v101_v37, %v96_v21  ;;  %v103_v55 = vmul.f32 %v101_v37, %v88_v19  ;;  %v170_v21 = vld [vmem:[%s423_s3] sm:$0xff] }
  0x8f   :  { %v39_v20 = vpop.permute.xlu1 %38  ;;  %v29_v24 = vpop.permute.xlu0 %28 }
  0x90   :  { %v50_v36 = vmul.f32 %v49_v31, %v29_v24  ;;  %v52_v58 = vmul.f32 %v49_v31, %v39_v20 }
  0x92   :  { %v78_v43 = vadd.f32 %v74_v40, %v50_v36 }
  0x93   :  { %v34_v30 = vpop.permute.xlu0 %33 }
  0x94   :  { %v64_v23 = vpop.permute.xlu1 %63  ;;  %v51_v44 = vmul.f32 %v49_v31, %v34_v30  ;;  %v106_v53 = vadd.f32 %v102_v42, %v78_v43 }
  0x95   :  { %v76_v54 = vmul.f32 %v73_v34, %v64_v23 }
  0x96   :  { %v79_v51 = vadd.f32 %v75_v47, %v51_v44  ;;  %v134_v61 = vadd.f32 %v130_v49, %v106_v53 }
  0x97   :  { %v44_v38 = vpop.permute.xlu0 %43  ;;  %v80_v1 = vadd.f32 %v76_v54, %v52_v58 }
  0x98   :  { %v68_v26 = vpop.permute.xlu1 %67  ;;  %v53_v45 = vmul.f32 %v49_v31, %v44_v38  ;;  %v107_v0 = vadd.f32 %v103_v55, %v79_v51 }
  0x99   :  { %v77_v46 = vmul.f32 %v73_v34, %v68_v26 }
  0x9b   :  { %v81_v52 = vadd.f32 %v77_v46, %v53_v45  ;;  %v145_v59 = vpop.permute.xlu0 %144 }
  0x9c   :  { %v162_v2 = vadd.f32 %v145_v59, %v134_v61 }
  0x9d   :  { %v116_v32 = vpop.permute.xlu1 %115  ;;  %v109_v63 = vadd.f32 %v105_v50, %v81_v52 }
  0x9e   :  { %v131_v56 = vmul.f32 %v129_v41, %v116_v32  ;;  %v166_v10 = vmax.f32 %v162_v2, 0.0 }
  0x9f   :  { %v160_v9 = vpop.permute.xlu0 %159 }
  0xa0   :  { %v135_v5 = vadd.f32 %v131_v56, %v107_v0 }
  0xa2   :  { %v92_v39 = vpop.permute.xlu1 %91 }
  0xa3   :  { %v104_v62 = vmul.f32 %v101_v37, %v92_v39 }
  0xa5   :  { %v108_v7 = vadd.f32 %v104_v62, %v80_v1 }
  0xa7   :  { %v120_v48 = vpop.permute.xlu1 %119 }
  0xa8   :  { %v132_v3 = vmul.f32 %v129_v41, %v120_v48 }
  0xaa   :  { %v136_v14 = vadd.f32 %v132_v3, %v108_v7 }
  0xab   :  { %v124_v57 = vpop.permute.xlu1 %123 }
  0xac   :  { %v133_v60 = vmul.f32 %v129_v41, %v124_v57 }
  0xae   :  { %v137_v4 = vadd.f32 %v133_v60, %v109_v63 }
  0xb0   :  { %v150_v6 = vpop.permute.xlu1 %149  ;;  %v165_v11 = vadd.f32 %v160_v9, %v137_v4 }
  0xb1   :  { %v163_v8 = vadd.f32 %v150_v6, %v135_v5 }
  0xb2   :  { %v169_v19 = vmax.f32 %v165_v11, 0.0 }
  0xb3   :  { %v167_v12 = vmax.f32 %v163_v8, 0.0 }
  0xb4   :  { %v155_v15 = vpop.permute.xlu1 %154 }
  0xb5   :  { %v164_v16 = vadd.f32 %v155_v15, %v136_v14  ;;  %v285_v17 = vpack.c.bf16 %v167_v12, %v166_v10 }
  0xb7   :  { %v168_v18 = vmax.f32 %v164_v16, 0.0  ;;  %286 = vmatpush3.bf16.msra.mxu0 %v285_v17 }
  0xb8   :  { %287 = vmatprep.subr.bf16.mxu0 %v339_v13  ;;  %v175_v22 = vpop.permute.xlu1 %174 }
  0xb9   :  { %v288_v20 = vpack.c.bf16 %v169_v19, %v168_v18 }
  0xbb   :  { %289 = vmatpush3.bf16.msra.mxu0 %v288_v20 }
  0xbe   :  { %282 = vmatmul.mubr.msk.f32.vlgmr.msra.gmra.mrb[0].mxu0 %vm177_vm1, %v170_v21 }
 0x191   :  { %v247_v23 = vpop.f32.mrb[0].mxu0 }
 0x192   :  { %v248_v24 = vadd.f32 %v247_v23, %v175_v22  ;;  %v283_v25 = vpop.f32.mrb[1].mxu0 }
 0x194   :  { %309 = vtanh.f32 %v248_v24 }
 0x19e   :  { %v310_v26 = vpop.eup %309 }
 0x19f   :  { %252 = vst [vmem:[#allocation2] sm:$0xff] %v310_v26 }
 0x1a0   :  { %322 = shalt.err (!%p319_p4)
}
 0x1a1   :  { %s323_s15 = scalar_lea.hbm %s425_s5, 128 }
 0x1a2   :  { %p324_p5 = scmp.ne.s32.totalorder %s425_s5, %s323_s15  ;;  %p327_p6 = scmp.lt.u32.totalorder %s323_s15, %s425_s5 }
 0x1a4   :  { %p329_p7 = pnand %p327_p6, %p324_p5 }
 0x1a6   :  { %332 = shalt.err (!%p329_p7)
}
 0x1a7   :  { %262 = dma.vmem_to_hbm [thread:$0]  %s260_s12, 128, %s425_s5, [#allocation3]  }
 0x1a8   :  { %333 = dma.done.wait [#allocation3], 128  }
 0x1a9   :  { %334 = vsyncadd [#allocation3], 4294967168 }
 0x1aa   :  { %266 = vsyncpa [#allocation3], 1 }

</bundles_post_ra>
